<compile_context>
chip_gen: v7x
topology: tpu7x:2x2x1
jax: 0.10.0
libtpu: 0.0.40
codegen_flags: <defaults>
</compile_context>

<pallas_src>
import functools

import numpy as np
import jax
import jax.numpy as jnp
from jax import lax
from jax.experimental import pallas as pl
from jax.experimental.pallas import tpu as pltpu

MXU_DTYPE = jnp.bfloat16          # matmul operands; accumulation stays fp32


def _round_up(x, m):
    return (x + m - 1) // m * m


# ----------------------------------------------------------------------------
# Pallas kernels
# ----------------------------------------------------------------------------

def _mm_fused_kernel(a_ref, b_ref, s_ref, c_ref, o_ref, *, act):
    """K-tiled matmul that accumulates directly into the f32 output block and
    applies the per-channel affine (+activation) epilogue on the last K step."""
    k = pl.program_id(1)

    @pl.when(k == 0)
    def _():
        o_ref[...] = jnp.zeros_like(o_ref)

    o_ref[...] += jnp.dot(a_ref[...], b_ref[...],
                          preferred_element_type=jnp.float32)

    @pl.when(k == pl.num_programs(1) - 1)
    def _():
        y = o_ref[...] * s_ref[...] + c_ref[...]
        if act == "relu":
            y = jnp.maximum(y, 0.0)
        elif act == "sigmoid":
            y = jax.nn.sigmoid(y)
        o_ref[...] = y


@functools.partial(jax.jit, static_argnames=("act",))
def matmul_affine_act(a, b, scale, bias, act="none"):
    """y = act((a @ b) * scale + bias).  a:(M,K), b:(K,N), scale/bias:(N,)."""
    M, K = a.shape
    K2, N = b.shape
    assert K == K2
    TK = 256                       # matches 256-deep MXU on v6e/v7x
    TM = 256
    Kp = _round_up(K, TK)
    if M <= TM:
        TMe, Mp = M, M
    else:
        TMe, Mp = TM, _round_up(M, TM)

    a = a.astype(MXU_DTYPE)
    b = b.astype(MXU_DTYPE)
    if Mp != M or Kp != K:
        a = jnp.pad(a, ((0, Mp - M), (0, Kp - K)))
    if Kp != K:
        b = jnp.pad(b, ((0, Kp - K), (0, 0)))

    out = pl.pallas_call(
        functools.partial(_mm_fused_kernel, act=act),
        out_shape=jax.ShapeDtypeStruct((Mp, N), jnp.float32),
        grid=(Mp // TMe, Kp // TK),
        in_specs=[pl.BlockSpec((TMe, TK), lambda i, k: (i, k)),
                  pl.BlockSpec((TK, N), lambda i, k: (k, 0)),
                  pl.BlockSpec((1, N), lambda i, k: (0, 0)),
                  pl.BlockSpec((1, N), lambda i, k: (0, 0))],
        out_specs=pl.BlockSpec((TMe, N), lambda i, k: (i, 0)),
        compiler_params=pltpu.CompilerParams(
            dimension_semantics=("parallel", "arbitrary")),
    )(a, b,
      scale.reshape(1, N).astype(jnp.float32),
      bias.reshape(1, N).astype(jnp.float32))
    return out[:M] if Mp != M else out


def _grouped_mm_bn_relu_kernel(a_ref, b_ref, s_ref, c_ref, o_ref):
    """Batched-per-group matmul (grouped conv) with fused BN affine + ReLU.
    a:(G,TM,Kg) bf16, b:(G,Kg,Ng) bf16, s/c:(G,1,Ng) f32 -> o:(G,TM,Ng) f32."""
    y = lax.dot_general(a_ref[...], b_ref[...],
                        dimension_numbers=(((2,), (1,)), ((0,), (0,))),
                        preferred_element_type=jnp.float32)
    o_ref[...] = jnp.maximum(y * s_ref[...] + c_ref[...], 0.0)


@jax.jit
def grouped_matmul_bn_relu(a, b, scale, bias):
    """a:(G,M,Kg), b:(G,Kg,Ng), scale/bias:(G,1,Ng) -> (G,M,Ng)."""
    G, M, Kg = a.shape
    Ng = b.shape[2]
    TM = 512
    if M <= TM:
        TMe, Mp = M, M
    else:
        TMe, Mp = TM, _round_up(M, TM)

    a = a.astype(MXU_DTYPE)
    if Mp != M:
        a = jnp.pad(a, ((0, 0), (0, Mp - M), (0, 0)))
    b = b.astype(MXU_DTYPE)

    out = pl.pallas_call(
        _grouped_mm_bn_relu_kernel,
        out_shape=jax.ShapeDtypeStruct((G, Mp, Ng), jnp.float32),
        grid=(Mp // TMe,),
        in_specs=[pl.BlockSpec((G, TMe, Kg), lambda i: (0, i, 0)),
                  pl.BlockSpec((G, Kg, Ng), lambda i: (0, 0, 0)),
                  pl.BlockSpec((G, 1, Ng), lambda i: (0, 0, 0)),
                  pl.BlockSpec((G, 1, Ng), lambda i: (0, 0, 0))],
        out_specs=pl.BlockSpec((G, TMe, Ng), lambda i: (0, i, 0)),
        compiler_params=pltpu.CompilerParams(
            dimension_semantics=("parallel",)),
    )(a, b, scale.astype(jnp.float32), bias.astype(jnp.float32))
    return out[:, :M] if Mp != M else out


def _se_residual_kernel(x_ref, id_ref, w1_ref, b1_ref, w2_ref, b2_ref, o_ref):
    """Fused SE module + residual: squeeze -> FC/ReLU -> FC/sigmoid -> gate ->
    add identity -> ReLU, all in one kernel."""
    x = x_ref[...]                                    # (N, HW, C) f32
    pooled = jnp.mean(x, axis=1)                      # (N, C) squeeze
    z = jnp.dot(pooled.astype(MXU_DTYPE), w1_ref[...],
                preferred_element_type=jnp.float32) + b1_ref[...]
    z = jnp.maximum(z, 0.0)
    g = jnp.dot(z.astype(MXU_DTYPE), w2_ref[...],
                preferred_element_type=jnp.float32) + b2_ref[...]
    g = jax.nn.sigmoid(g)                             # (N, C) excitation gate
    o_ref[...] = jnp.maximum(x * g[:, None, :] + id_ref[...], 0.0)


@jax.jit
def se_residual(x, identity, w1, b1, w2, b2):
    N, H, W, C = x.shape
    HW = H * W
    Cr = w1.shape[1]
    x2 = x.reshape(N, HW, C)
    id2 = identity.reshape(N, HW, C)
    out = pl.pallas_call(
        _se_residual_kernel,
        out_shape=jax.ShapeDtypeStruct((N, HW, C), jnp.float32),
        grid=(1,),
        in_specs=[pl.BlockSpec((N, HW, C), lambda i: (0, 0, 0)),
                  pl.BlockSpec((N, HW, C), lambda i: (0, 0, 0)),
                  pl.BlockSpec((C, Cr), lambda i: (0, 0)),
                  pl.BlockSpec((1, Cr), lambda i: (0, 0)),
                  pl.BlockSpec((Cr, C), lambda i: (0, 0)),
                  pl.BlockSpec((1, C), lambda i: (0, 0))],
        out_specs=pl.BlockSpec((N, HW, C), lambda i: (0, 0, 0)),
    )(x2, id2,
      w1.astype(MXU_DTYPE), b1.reshape(1, Cr).astype(jnp.float32),
      w2.astype(MXU_DTYPE), b2.reshape(1, C).astype(jnp.float32))
    return out.reshape(N, H, W, C)


def _affine_kernel(x_ref, s_ref, b_ref, o_ref):
    o_ref[...] = x_ref[...] * s_ref[...] + b_ref[...]


@jax.jit
def rgb_normalize(x, scale, bias):
    """Per-channel (x - mean)/std on an NHWC tensor, row-tiled."""
    N, H, W, C = x.shape
    R = N * H * W
    x2 = x.reshape(R, C)
    TR = R if R <= 1024 else 512
    Rp = _round_up(R, TR)
    if Rp != R:
        x2 = jnp.pad(x2, ((0, Rp - R), (0, 0)))
    out = pl.pallas_call(
        _affine_kernel,
        out_shape=jax.ShapeDtypeStruct((Rp, C), jnp.float32),
        grid=(Rp // TR,),
        in_specs=[pl.BlockSpec((TR, C), lambda i: (i, 0)),
                  pl.BlockSpec((1, C), lambda i: (0, 0)),
                  pl.BlockSpec((1, C), lambda i: (0, 0))],
        out_specs=pl.BlockSpec((TR, C), lambda i: (i, 0)),
        compiler_params=pltpu.CompilerParams(
            dimension_semantics=("parallel",)),
    )(x2, scale.reshape(1, C), bias.reshape(1, C))
    out = out[:R] if Rp != R else out
    return out.reshape(N, H, W, C)


def _max_taps_kernel(x_ref, o_ref):
    o_ref[...] = jnp.max(x_ref[...], axis=0)


@jax.jit
def max_over_taps(taps):
    """taps: (T, R, C) -> (R, C), max over the window-tap axis (max-pool)."""
    T, R, C = taps.shape
    TR = R if R <= 1024 else 512
    Rp = _round_up(R, TR)
    if Rp != R:
        taps = jnp.pad(taps, ((0, 0), (0, Rp - R), (0, 0)))
    out = pl.pallas_call(
        _max_taps_kernel,
        out_shape=jax.ShapeDtypeStruct((Rp, C), jnp.float32),
        grid=(Rp // TR,),
        in_specs=[pl.BlockSpec((T, TR, C), lambda i: (0, i, 0))],
        out_specs=pl.BlockSpec((TR, C), lambda i: (i, 0)),
        compiler_params=pltpu.CompilerParams(
            dimension_semantics=("parallel",)),
    )(taps)
    return out[:R] if Rp != R else out


def _gap_kernel(x_ref, o_ref):
    o_ref[...] = jnp.mean(x_ref[...], axis=1)


@jax.jit
def global_avg_pool(x):
    """x: (N, HW, C) -> (N, C)  (F.adaptive_avg_pool2d(x, 1))."""
    N, HW, C = x.shape
    return pl.pallas_call(
        _gap_kernel,
        out_shape=jax.ShapeDtypeStruct((N, C), jnp.float32),
        grid=(1,),
        in_specs=[pl.BlockSpec((N, HW, C), lambda i: (0, 0, 0))],
        out_specs=pl.BlockSpec((N, C), lambda i: (0, 0)),
    )(x)


# ----------------------------------------------------------------------------
# Glue: im2col, conv / pool / bottleneck built from the kernels
# ----------------------------------------------------------------------------

def im2col(x, kh, kw, stride, pad):
    """Returns patches (N, Ho, Wo, kh*kw, C) — tap-major, channel-minor."""
    N, H, W, C = x.shape
    xp = jnp.pad(x, ((0, 0), (pad, pad), (pad, pad), (0, 0))) if pad else x
    Ho = (H + 2 * pad - kh) // stride + 1
    Wo = (W + 2 * pad - kw) // stride + 1
    if kh == 1 and kw == 1:
        cols = xp[:, :stride * Ho:stride, :stride * Wo:stride, :]
        return cols.reshape(N, Ho, Wo, 1, C), (N, Ho, Wo)
    cols = [xp[:, i:i + stride * Ho:stride, j:j + stride * Wo:stride, :]
            for i in range(kh) for j in range(kw)]
    return jnp.stack(cols, axis=3), (N, Ho, Wo)


def conv_bn_act(x, wmat, kh, kw, stride, pad, scale, bias, act):
    """Dense conv expressed as im2col + MXU matmul; BN/act fused in epilogue.
    wmat: (kh*kw*Cin, Cout) matmul-ready (bf16)."""
    C = x.shape[-1]
    patches, (n, ho, wo) = im2col(x, kh, kw, stride, pad)
    cols = patches.reshape(n * ho * wo, kh * kw * C)
    y = matmul_affine_act(cols, wmat, scale, bias, act=act)
    return y.reshape(n, ho, wo, wmat.shape[1])


def grouped_conv_bn_relu(x, w_g, stride, scale, bias):
    """Grouped 3x3 conv (groups=32) + BN + ReLU via the grouped matmul kernel.
    w_g: (G, 9*Cig, Cog) matmul-ready (bf16)."""
    N, H, W, C = x.shape
    G, KG, Cog = w_g.shape
    Cig = C // G
    patches, (n, ho, wo) = im2col(x, 3, 3, stride, 1)      # (N,Ho,Wo,9,C)
    M = n * ho * wo
    pg = patches.reshape(M, 9, G, Cig)
    pg = jnp.transpose(pg, (2, 0, 1, 3)).reshape(G, M, 9 * Cig)
    s = scale.reshape(G, 1, Cog)
    b = bias.reshape(G, 1, Cog)
    out = grouped_matmul_bn_relu(pg, w_g, s, b)            # (G, M, Cog)
    out = jnp.transpose(out, (1, 0, 2)).reshape(n, ho, wo, G * Cog)
    return out


def max_pool_3x3_s2(x):
    # TODO(synk): reference uses ceil_mode max-pool; padding=1 floor mode gives
    # identical output sizes for the even spatial dims used here.
    N, H, W, C = x.shape
    k, stride, pad = 3, 2, 1
    xp = jnp.pad(x, ((0, 0), (pad, pad), (pad, pad), (0, 0)),
                 constant_values=-jnp.inf)
    Ho = (H + 2 * pad - k) // stride + 1
    Wo = (W + 2 * pad - k) // stride + 1
    cols = [xp[:, i:i + stride * Ho:stride, j:j + stride * Wo:stride, :]
            for i in range(k) for j in range(k)]
    taps = jnp.stack(cols, axis=0).reshape(k * k, N * Ho * Wo, C)
    return max_over_taps(taps).reshape(N, Ho, Wo, C)


def bottleneck(x, p):
    out = conv_bn_act(x, p["conv1_wm"], 1, 1, 1, 0,
                      p["bn1_s"], p["bn1_b"], "relu")
    out = grouped_conv_bn_relu(out, p["conv2_wg"], p["stride"],
                               p["bn2_s"], p["bn2_b"])
    out = conv_bn_act(out, p["conv3_wm"], 1, 1, 1, 0,
                      p["bn3_s"], p["bn3_b"], "none")
    if "down_wm" in p:
        identity = conv_bn_act(x, p["down_wm"], 1, 1, p["stride"], 0,
                               p["down_s"], p["down_b"], "none")
    else:
        identity = x
    return se_residual(out, identity,
                       p["se_w1"], p["se_b1"], p["se_w2"], p["se_b2"])


# ----------------------------------------------------------------------------
# Model definition (se_resnext50_32x4d) + deterministic synthetic init
# ----------------------------------------------------------------------------

IMAGE_RGB_MEAN = np.array([0.485, 0.456, 0.406], np.float32)
IMAGE_RGB_STD = np.array([0.229, 0.224, 0.225], np.float32)

GROUPS = 32
SE_REDUCTION = 16
STAGES = [
    # (num_blocks, in_c, mid_c (width), out_c, first_stride)
    (3,   64,  128,  256, 1),
    (4,  256,  256,  512, 2),
    (6,  512,  512, 1024, 2),
    (3, 1024, 1024, 2048, 2),
]
NUM_CLASS = (168, 11, 7)
HEAD_PAD = 256          # lane-dense padded width for the fused classifier heads


def _conv_wmat(key, cout, cin, kh, kw):
    fan_in = cin * kh * kw
    w = (jax.random.normal(key, (cout, cin, kh, kw), jnp.float32)
         * np.sqrt(2.0 / fan_in))
    # matmul-ready: (kh*kw*cin, cout), tap-major / channel-minor rows
    return jnp.transpose(w, (2, 3, 1, 0)).reshape(kh * kw * cin, cout) \
              .astype(MXU_DTYPE)


def _grouped_conv_wmat(key, cout, cin, k, groups):
    cog, cig = cout // groups, cin // groups
    w = (jax.random.normal(key, (groups, cog, cig, k, k), jnp.float32)
         * np.sqrt(2.0 / (cig * k * k)))
    # matmul-ready: (groups, k*k*cig, cog), tap-major / channel-minor rows
    return jnp.transpose(w, (0, 3, 4, 2, 1)).reshape(groups, k * k * cig, cog) \
              .astype(MXU_DTYPE)


def _bn_fold(key, c, gamma_scale=1.0, eps=1e-5):
    """Inference-mode BN folded to a per-channel (scale, bias)."""
    k1, k2 = jax.random.split(key)
    gamma = gamma_scale * (1.0 + 0.05 * jax.random.normal(k1, (c,), jnp.float32))
    beta = 0.02 * jax.random.normal(k2, (c,), jnp.float32)
    mean = jnp.zeros((c,), jnp.float32)
    var = jnp.ones((c,), jnp.float32)
    s = gamma / jnp.sqrt(var + eps)
    b = beta - mean * s
    return s, b


def init_params(key):
    keys = iter(jax.random.split(key, 1024))
    nk = lambda: next(keys)
    params = {
        "rgb_scale": jnp.asarray(1.0 / IMAGE_RGB_STD),
        "rgb_bias": jnp.asarray(-IMAGE_RGB_MEAN / IMAGE_RGB_STD),
    }
    bn0_s, bn0_b = _bn_fold(nk(), 64)
    params["block0"] = dict(wm=_conv_wmat(nk(), 64, 3, 7, 7),
                            bn_s=bn0_s, bn_b=bn0_b)

    for s, (n_blocks, in_c, mid_c, out_c, first_stride) in enumerate(STAGES, 1):
        blocks = []
        for b in range(n_blocks):
            stride = first_stride if b == 0 else 1
            cin = in_c if b == 0 else out_c
            se_c = out_c // SE_REDUCTION
            bn1_s, bn1_b = _bn_fold(nk(), mid_c)
            bn2_s, bn2_b = _bn_fold(nk(), mid_c)
            bn3_s, bn3_b = _bn_fold(nk(), out_c, gamma_scale=0.25)
            p = dict(
                stride=stride,
                conv1_wm=_conv_wmat(nk(), mid_c, cin, 1, 1),
                bn1_s=bn1_s, bn1_b=bn1_b,
                conv2_wg=_grouped_conv_wmat(nk(), mid_c, mid_c, 3, GROUPS),
                bn2_s=bn2_s, bn2_b=bn2_b,
                conv3_wm=_conv_wmat(nk(), out_c, mid_c, 1, 1),
                bn3_s=bn3_s, bn3_b=bn3_b,
                se_w1=jax.random.normal(nk(), (out_c, se_c), jnp.float32)
                      * np.sqrt(2.0 / out_c),
                se_b1=jnp.zeros((se_c,), jnp.float32),
                se_w2=jax.random.normal(nk(), (se_c, out_c), jnp.float32)
                      * np.sqrt(2.0 / se_c),
                se_b2=jnp.zeros((out_c,), jnp.float32),
            )
            if b == 0:
                d_s, d_b = _bn_fold(nk(), out_c)
                p["down_wm"] = _conv_wmat(nk(), out_c, cin, 1, 1)
                p["down_s"] = d_s
                p["down_b"] = d_b
            blocks.append(p)
        params[f"block{s}"] = blocks

    # Classifier heads fused into one lane-dense (2048, HEAD_PAD) matmul.
    head_ws, head_bs = [], []
    for c in NUM_CLASS:
        head_ws.append(jax.random.normal(nk(), (2048, c), jnp.float32)
                       * np.sqrt(1.0 / 2048))
        head_bs.append(jnp.zeros((c,), jnp.float32))
    wcat = jnp.concatenate(head_ws, axis=1)
    bcat = jnp.concatenate(head_bs)
    total = wcat.shape[1]
    params["logit_w"] = jnp.pad(wcat, ((0, 0), (0, HEAD_PAD - total))) \
                           .astype(MXU_DTYPE)
    params["logit_b"] = jnp.pad(bcat, (0, HEAD_PAD - total))
    params["logit_s"] = jnp.ones((HEAD_PAD,), jnp.float32)
    offs = np.cumsum([0] + list(NUM_CLASS))
    params["logit_slices"] = [(int(offs[i]), int(offs[i + 1]))
                              for i in range(len(NUM_CLASS))]
    return params


def serex50_forward(x_nchw, params):
    """Mirrors Serex50_Net.forward: rgb -> block0..4 -> avgpool -> 3 logits."""
    N, C, H, W = x_nchw.shape
    x = jnp.transpose(x_nchw, (0, 2, 3, 1)).astype(jnp.float32)   # NCHW -> NHWC
    x = rgb_normalize(x, params["rgb_scale"], params["rgb_bias"])
    # block0: 7x7/2 conv with BN+ReLU fused into the matmul epilogue
    x = conv_bn_act(x, params["block0"]["wm"], 7, 7, 2, 3,
                    params["block0"]["bn_s"], params["block0"]["bn_b"], "relu")
    # block1 starts with a 3x3/2 max-pool, then SE-ResNeXt bottleneck stages
    x = max_pool_3x3_s2(x)
    for stage in ("block1", "block2", "block3", "block4"):
        for blk in params[stage]:
            x = bottleneck(x, blk)
    # F.adaptive_avg_pool2d(x, 1).reshape(batch_size, -1)
    n, h, w, c = x.shape
    feat = global_avg_pool(x.reshape(n, h * w, c))                # (N, 2048)
    # logit = [l(feat) for l in self.logit] -> one fused lane-dense matmul
    y = matmul_affine_act(feat, params["logit_w"], params["logit_s"],
                          params["logit_b"], act="none")
    return [y[:, a:b] for (a, b) in params["logit_slices"]]


# ----------------------------------------------------------------------------

if __name__ == "__main__":
    root = jax.random.PRNGKey(0)
    pkey, xkey = jax.random.split(root)
    params = init_params(pkey)

    # NCHW input like the PyTorch module; 32x32 spatial (32x downsample -> 1x1)
    x = jax.random.uniform(xkey, (2, 3, 32, 32), dtype=jnp.float32)

    logits = serex50_forward(x, params)
    logits = [jax.block_until_ready(l) for l in logits]

    expected = [(2, c) for c in NUM_CLASS]
    assert [tuple(l.shape) for l in logits] == expected, \
        [tuple(l.shape) for l in logits]
    assert all(bool(jnp.all(jnp.isfinite(l))) for l in logits)
    print("KERNEL_OK")
</pallas_src>

<mosaic_0001>
module attributes {stable_mosaic.version = 11 : i64} {
  func.func @_affine_kernel(%arg0: i32, %arg1: memref<512x3xf32, #tpu.memory_space<vmem>>, %arg2: memref<1x3xf32, #tpu.memory_space<vmem>>, %arg3: memref<1x3xf32, #tpu.memory_space<vmem>>, %arg4: memref<512x3xf32, #tpu.memory_space<vmem>>) attributes {dimension_semantics = [#tpu.dimension_semantics<parallel>], iteration_bounds = array<i64: 4>, scalar_prefetch = 0 : i64, scratch_operands = 0 : i64, tpu.core_type = #tpu.core_type<tc>, window_params = [{transform_indices = @transform_0, window_bounds = array<i64: 512, 3>}, {pipeline_mode = #tpu.pipeline_mode<synchronous>, transform_indices = @transform_1, window_bounds = array<i64: 1, 3>}, {pipeline_mode = #tpu.pipeline_mode<synchronous>, transform_indices = @transform_2, window_bounds = array<i64: 1, 3>}, {transform_indices = @transform_3, window_bounds = array<i64: 512, 3>}]} {
    %c0 = arith.constant 0 : index
    %c0_0 = arith.constant 0 : index
    %0 = vector.load %arg1[%c0, %c0_0] : memref<512x3xf32, #tpu.memory_space<vmem>>, vector<512x3xf32>
    %c0_1 = arith.constant 0 : index
    %c0_2 = arith.constant 0 : index
    %1 = vector.load %arg2[%c0_1, %c0_2] : memref<1x3xf32, #tpu.memory_space<vmem>>, vector<1x3xf32>
    %2 = vector.broadcast %1 : vector<1x3xf32> to vector<512x3xf32>
    %3 = arith.mulf %0, %2 : vector<512x3xf32>
    %c0_3 = arith.constant 0 : index
    %c0_4 = arith.constant 0 : index
    %4 = vector.load %arg3[%c0_3, %c0_4] : memref<1x3xf32, #tpu.memory_space<vmem>>, vector<1x3xf32>
    %5 = vector.broadcast %4 : vector<1x3xf32> to vector<512x3xf32>
    %6 = arith.addf %3, %5 : vector<512x3xf32>
    %c0_5 = arith.constant 0 : index
    %c0_6 = arith.constant 0 : index
    %7 = vector.load %arg4[%c0_5, %c0_6] : memref<512x3xf32, #tpu.memory_space<vmem>>, vector<512x3xf32>
    tpu.vector_store %arg4[%c0_5, %c0_6], %6 {strides = array<i32>} : memref<512x3xf32, #tpu.memory_space<vmem>>, vector<512x3xf32>,
    return
  }
  func.func @transform_0(%arg0: i32) -> (i32, i32) {
    %c0_i32 = arith.constant 0 : i32
    %c0_i32_0 = arith.constant 0 : i32
    return %arg0, %c0_i32 : i32, i32
  }
  func.func @transform_1(%arg0: i32) -> (i32, i32) {
    %c0_i32 = arith.constant 0 : i32
    %c0_i32_0 = arith.constant 0 : i32
    %c0_i32_1 = arith.constant 0 : i32
    return %c0_i32, %c0_i32_0 : i32, i32
  }
  func.func @transform_2(%arg0: i32) -> (i32, i32) {
    %c0_i32 = arith.constant 0 : i32
    %c0_i32_0 = arith.constant 0 : i32
    %c0_i32_1 = arith.constant 0 : i32
    return %c0_i32, %c0_i32_0 : i32, i32
  }
  func.func @transform_3(%arg0: i32) -> (i32, i32) {
    %c0_i32 = arith.constant 0 : i32
    %c0_i32_0 = arith.constant 0 : i32
    return %arg0, %c0_i32 : i32, i32
  }
}

</mosaic_0001>

<bundles_post_ra>
// kernel: rgb_normalize.1
= control target key start
LH: loop header
LB: loop body
LE: loop exit
PB: predicated region body
PF: predicated region fallthrough
CT: control target
= control target key end

     0   :  { %s550_s12 = smov 0   ;;  %s901_s0 = inlined_call_operand.vmem [shape: f32[2048,3], index: 0, kind: input, shape index: {}]   ;;  %s902_s1 = inlined_call_operand.vmem [shape: f32[1,3], index: 1, kind: input, shape index: {}]   ;;  %s903_s2 = inlined_call_operand.vmem [shape: f32[1,3], index: 2, kind: input, shape index: {}]   ;;  %s904_s3 = inlined_call_operand.vmem [shape: f32[2048,3], index: 3, kind: output, shape index: {}]  }
   0x1 LB: > { %s501_s13 = sadd.s32 4294967295, %s528_s12   ;;  %p505_p0 = scmp.ge.s32.totalorder %s528_s12, 1  ;;  %s528_s12 = sphi %s550_s12, %s13_s12  }
   0x2   : > { %p138_p1 = scmp.lt.s32.totalorder %s528_s12, 5 }
   0x4   : > { %p139_p2 = pnand %p505_p0, %p138_p1 }
   0x5   : > { %s506_s14 = sshll.u32 (!%p139_p2), %s501_s13, 6  ;;  %v561_v0 = vld [vmem:[%s902_s1] ss:$0 sm:$0xff] (!%p139_p2)  ;;  %vm380_vm0 = vcmask (!%p139_p2), 23552  }
   0x6   : > { %142 = sbr.rel (%p139_p2) target bundleno = 59 (0x3b), region = 32  ;;  %p163_p3 = scmp.lt.s32.totalorder (!%p139_p2), %s506_s14, 255  ;;  %v571_v1 = vld [vmem:[%s903_s2] ss:$0 sm:$0xff] (!%p139_p2) }
   0xd   : > { %s906_s14 = smov (!%p163_p3, %s506_s14), 255 }
   0xe   : > { %s507_s15 = sshll.u32 %s906_s14, 3 }
   0xf   : > { %s566_s20 = scalar_lea.vmem %s901_s0, %s507_s15  ;;  %s585_s25 = scalar_lea.vmem %s904_s3, %s507_s15 }
  0x10   : > { %v174_v2 = vld [vmem:[%s566_s20] sm:$0xff]  ;;  %v175_v3 = vld [vmem:[%s566_s20 + $0x8] sm:$0xff]  ;;  %v176_v4 = vld [vmem:[%s566_s20 + $0x10] sm:$0xff] }
  0x11   : > { %v245_v5 = vmul.f32 %v561_v0, %v174_v2  ;;  %v246_v6 = vmul.f32 %v561_v0, %v175_v3  ;;  %v247_v7 = vmul.f32 %v561_v0, %v176_v4  ;;  %v177_v8 = vld [vmem:[%s566_s20 + $0x18] sm:$0xff]  ;;  %v178_v9 = vld [vmem:[%s566_s20 + $0x20] sm:$0xff]  ;;  %v179_v10 = vld [vmem:[%s566_s20 + $0x28] sm:$0xff] }
  0x12   : > { %v248_v11 = vmul.f32 %v561_v0, %v177_v8  ;;  %v249_v12 = vmul.f32 %v561_v0, %v178_v9  ;;  %v250_v13 = vmul.f32 %v561_v0, %v179_v10  ;;  %v180_v14 = vld [vmem:[%s566_s20 + $0x30] sm:$0xff]  ;;  %v181_v15 = vld [vmem:[%s566_s20 + $0x38] sm:$0xff]  ;;  %v182_v16 = vld [vmem:[%s566_s20 + $0x40] sm:$0xff] }
  0x13   : > { %v316_v17 = vadd.f32 %v571_v1, %v245_v5  ;;  %v317_v18 = vadd.f32 %v571_v1, %v246_v6  ;;  %v318_v19 = vadd.f32 %v571_v1, %v247_v7  ;;  %v251_v20 = vmul.f32 %v561_v0, %v180_v14  ;;  %v183_v21 = vld [vmem:[%s566_s20 + $0x48] sm:$0xff]  ;;  %v184_v22 = vld [vmem:[%s566_s20 + $0x50] sm:$0xff]  ;;  %v185_v23 = vld [vmem:[%s566_s20 + $0x58] sm:$0xff] }
  0x14   : > { %v319_v24 = vadd.f32 %v571_v1, %v248_v11  ;;  %v320_v25 = vadd.f32 %v571_v1, %v249_v12  ;;  %v321_v26 = vadd.f32 %v571_v1, %v250_v13  ;;  %v252_v27 = vmul.f32 %v561_v0, %v181_v15  ;;  %v186_v28 = vld [vmem:[%s566_s20 + $0x60] sm:$0xff]  ;;  %v187_v29 = vld [vmem:[%s566_s20 + $0x68] sm:$0xff]  ;;  %v188_v30 = vld [vmem:[%s566_s20 + $0x70] sm:$0xff] }
  0x15   : > { %381 = vst.msk [vmem:[%s585_s25] sm:$0xff] %vm380_vm0, %v316_v17  ;;  %382 = vst.msk [vmem:[%s585_s25 + $0x8] sm:$0xff] %vm380_vm0, %v317_v18  ;;  %v322_v31 = vadd.f32 %v571_v1, %v251_v20  ;;  %v253_v32 = vmul.f32 %v561_v0, %v182_v16  ;;  %v254_v33 = vmul.f32 %v561_v0, %v183_v21  ;;  %v189_v35 = vld [vmem:[%s566_s20 + $0x78] sm:$0xff]  ;;  %v190_v40 = vld [vmem:[%s566_s20 + $0x80] sm:$0xff] }
  0x16   : > { %383 = vst.msk [vmem:[%s585_s25 + $0x10] sm:$0xff] %vm380_vm0, %v318_v19  ;;  %v255_v34 = vmul.f32 %v561_v0, %v184_v22  ;;  %384 = vst.msk [vmem:[%s585_s25 + $0x18] sm:$0xff] %vm380_vm0, %v319_v24  ;;  %v323_v36 = vadd.f32 %v571_v1, %v252_v27  ;;  %v256_v37 = vmul.f32 %v561_v0, %v185_v23  ;;  %v191_v41 = vld [vmem:[%s566_s20 + $0x88] sm:$0xff]  ;;  %v192_v42 = vld [vmem:[%s566_s20 + $0x90] sm:$0xff] }
  0x17   : > { %385 = vst.msk [vmem:[%s585_s25 + $0x20] sm:$0xff] %vm380_vm0, %v320_v25  ;;  %386 = vst.msk [vmem:[%s585_s25 + $0x28] sm:$0xff] %vm380_vm0, %v321_v26  ;;  %v257_v38 = vmul.f32 %v561_v0, %v186_v28  ;;  %v258_v39 = vmul.f32 %v561_v0, %v187_v29  ;;  %v324_v43 = vadd.f32 %v571_v1, %v253_v32  ;;  %v193_v47 = vld [vmem:[%s566_s20 + $0x98] sm:$0xff]  ;;  %v194_v48 = vld [vmem:[%s566_s20 + $0xa0] sm:$0xff] }
  0x18   : > { %387 = vst.msk [vmem:[%s585_s25 + $0x30] sm:$0xff] %vm380_vm0, %v322_v31  ;;  %v325_v44 = vadd.f32 %v571_v1, %v254_v33  ;;  %v326_v45 = vadd.f32 %v571_v1, %v255_v34  ;;  %v259_v46 = vmul.f32 %v561_v0, %v188_v30  ;;  %v195_v49 = vld [vmem:[%s566_s20 + $0xa8] sm:$0xff]  ;;  %388 = vst.msk [vmem:[%s585_s25 + $0x38] sm:$0xff] %vm380_vm0, %v323_v36  ;;  %v196_v54 = vld [vmem:[%s566_s20 + $0xb0] sm:$0xff] }
  0x19   : > { %v327_v50 = vadd.f32 %v571_v1, %v256_v37  ;;  %v328_v51 = vadd.f32 %v571_v1, %v257_v38  ;;  %v329_v52 = vadd.f32 %v571_v1, %v258_v39  ;;  %v260_v53 = vmul.f32 %v561_v0, %v189_v35  ;;  %389 = vst.msk [vmem:[%s585_s25 + $0x40] sm:$0xff] %vm380_vm0, %v324_v43  ;;  %v197_v59 = vld [vmem:[%s566_s20 + $0xb8] sm:$0xff]  ;;  %v198_v2 = vld [vmem:[%s566_s20 + $0xc0] sm:$0xff]  ;;  %v199_v3 = vld [vmem:[%s566_s20 + $0xc8] sm:$0xff] }
  0x1a   : > { %390 = vst.msk [vmem:[%s585_s25 + $0x48] sm:$0xff] %vm380_vm0, %v325_v44  ;;  %391 = vst.msk [vmem:[%s585_s25 + $0x50] sm:$0xff] %vm380_vm0, %v326_v45  ;;  %v330_v55 = vadd.f32 %v571_v1, %v259_v46  ;;  %v261_v56 = vmul.f32 %v561_v0, %v190_v40  ;;  %v262_v57 = vmul.f32 %v561_v0, %v191_v41  ;;  %v200_v4 = vld [vmem:[%s566_s20 + $0xd0] sm:$0xff]  ;;  %v201_v9 = vld [vmem:[%s566_s20 + $0xd8] sm:$0xff] }
  0x1b   : > { %v263_v58 = vmul.f32 %v561_v0, %v192_v42  ;;  %392 = vst.msk [vmem:[%s585_s25 + $0x58] sm:$0xff] %vm380_vm0, %v327_v50  ;;  %393 = vst.msk [vmem:[%s585_s25 + $0x60] sm:$0xff] %vm380_vm0, %v328_v51  ;;  %v331_v60 = vadd.f32 %v571_v1, %v260_v53  ;;  %v264_v61 = vmul.f32 %v561_v0, %v193_v47  ;;  %v202_v10 = vld [vmem:[%s566_s20 + $0xe0] sm:$0xff]  ;;  %v203_v11 = vld [vmem:[%s566_s20 + $0xe8] sm:$0xff] }
  0x1c   : > { %394 = vst.msk [vmem:[%s585_s25 + $0x68] sm:$0xff] %vm380_vm0, %v329_v52  ;;  %v265_v62 = vmul.f32 %v561_v0, %v194_v48  ;;  %v266_v63 = vmul.f32 %v561_v0, %v195_v49  ;;  %395 = vst.msk [vmem:[%s585_s25 + $0x70] sm:$0xff] %vm380_vm0, %v330_v55  ;;  %v332_v5 = vadd.f32 %v571_v1, %v261_v56  ;;  %v204_v16 = vld [vmem:[%s566_s20 + $0xf0] sm:$0xff]  ;;  %v205_v21 = vld [vmem:[%s566_s20 + $0xf8] sm:$0xff] }
  0x1d   : > { %v333_v6 = vadd.f32 %v571_v1, %v262_v57  ;;  %v334_v7 = vadd.f32 %v571_v1, %v263_v58  ;;  %v267_v8 = vmul.f32 %v561_v0, %v196_v54  ;;  %396 = vst.msk [vmem:[%s585_s25 + $0x78] sm:$0xff] %vm380_vm0, %v331_v60  ;;  %v335_v12 = vadd.f32 %v571_v1, %v264_v61  ;;  %v206_v26 = vld [vmem:[%s566_s20 + $0x100] sm:$0xff]  ;;  %v207_v27 = vld [vmem:[%s566_s20 + $0x108] sm:$0xff]  ;;  %v208_v28 = vld [vmem:[%s566_s20 + $0x110] sm:$0xff] }
  0x1e   : > { %v336_v13 = vadd.f32 %v571_v1, %v265_v62  ;;  %v337_v14 = vadd.f32 %v571_v1, %v266_v63  ;;  %v268_v15 = vmul.f32 %v561_v0, %v197_v59  ;;  %397 = vst.msk [vmem:[%s585_s25 + $0x80] sm:$0xff] %vm380_vm0, %v332_v5  ;;  %v269_v18 = vmul.f32 %v561_v0, %v198_v2  ;;  %v209_v33 = vld [vmem:[%s566_s20 + $0x118] sm:$0xff]  ;;  %v210_v34 = vld [vmem:[%s566_s20 + $0x120] sm:$0xff]  ;;  %v211_v35 = vld [vmem:[%s566_s20 + $0x128] sm:$0xff] }
  0x1f   : > { %398 = vst.msk [vmem:[%s585_s25 + $0x88] sm:$0xff] %vm380_vm0, %v333_v6  ;;  %399 = vst.msk [vmem:[%s585_s25 + $0x90] sm:$0xff] %vm380_vm0, %v334_v7  ;;  %v338_v17 = vadd.f32 %v571_v1, %v267_v8  ;;  %v270_v19 = vmul.f32 %v561_v0, %v199_v3  ;;  %v271_v20 = vmul.f32 %v561_v0, %v200_v4  ;;  %v212_v40 = vld [vmem:[%s566_s20 + $0x130] sm:$0xff]  ;;  %v213_v45 = vld [vmem:[%s566_s20 + $0x138] sm:$0xff] }
  0x20   : > { %400 = vst.msk [vmem:[%s585_s25 + $0x98] sm:$0xff] %vm380_vm0, %v335_v12  ;;  %401 = vst.msk [vmem:[%s585_s25 + $0xa0] sm:$0xff] %vm380_vm0, %v336_v13  ;;  %v339_v22 = vadd.f32 %v571_v1, %v268_v15  ;;  %v272_v23 = vmul.f32 %v561_v0, %v201_v9  ;;  %v273_v24 = vmul.f32 %v561_v0, %v202_v10  ;;  %v214_v50 = vld [vmem:[%s566_s20 + $0x140] sm:$0xff]  ;;  %v215_v51 = vld [vmem:[%s566_s20 + $0x148] sm:$0xff] }
  0x21   : > { %402 = vst.msk [vmem:[%s585_s25 + $0xa8] sm:$0xff] %vm380_vm0, %v337_v14  ;;  %v274_v25 = vmul.f32 %v561_v0, %v203_v11  ;;  %403 = vst.msk [vmem:[%s585_s25 + $0xb0] sm:$0xff] %vm380_vm0, %v338_v17  ;;  %v340_v29 = vadd.f32 %v571_v1, %v269_v18  ;;  %v341_v30 = vadd.f32 %v571_v1, %v270_v19  ;;  %v216_v52 = vld [vmem:[%s566_s20 + $0x150] sm:$0xff]  ;;  %v217_v57 = vld [vmem:[%s566_s20 + $0x158] sm:$0xff] }
  0x22   : > { %v342_v31 = vadd.f32 %v571_v1, %v271_v20  ;;  %v275_v32 = vmul.f32 %v561_v0, %v204_v16  ;;  %404 = vst.msk [vmem:[%s585_s25 + $0xb8] sm:$0xff] %vm380_vm0, %v339_v22  ;;  %v343_v36 = vadd.f32 %v571_v1, %v272_v23  ;;  %v344_v37 = vadd.f32 %v571_v1, %v273_v24  ;;  %v218_v58 = vld [vmem:[%s566_s20 + $0x160] sm:$0xff]  ;;  %v219_v59 = vld [vmem:[%s566_s20 + $0x168] sm:$0xff]  ;;  %v220_v2 = vld [vmem:[%s566_s20 + $0x170] sm:$0xff] }
  0x23   : > { %v345_v38 = vadd.f32 %v571_v1, %v274_v25  ;;  %v276_v39 = vmul.f32 %v561_v0, %v205_v21  ;;  %405 = vst.msk [vmem:[%s585_s25 + $0xc0] sm:$0xff] %vm380_vm0, %v340_v29  ;;  %406 = vst.msk [vmem:[%s585_s25 + $0xc8] sm:$0xff] %vm380_vm0, %v341_v30  ;;  %v277_v42 = vmul.f32 %v561_v0, %v206_v26  ;;  %v221_v7 = vld [vmem:[%s566_s20 + $0x178] sm:$0xff]  ;;  %v222_v12 = vld [vmem:[%s566_s20 + $0x180] sm:$0xff] }
  0x24   : > { %407 = vst.msk [vmem:[%s585_s25 + $0xd0] sm:$0xff] %vm380_vm0, %v342_v31  ;;  %v346_v41 = vadd.f32 %v571_v1, %v275_v32  ;;  %v278_v43 = vmul.f32 %v561_v0, %v207_v27  ;;  %v279_v44 = vmul.f32 %v561_v0, %v208_v28  ;;  %408 = vst.msk [vmem:[%s585_s25 + $0xd8] sm:$0xff] %vm380_vm0, %v343_v36  ;;  %v223_v13 = vld [vmem:[%s566_s20 + $0x188] sm:$0xff]  ;;  %v224_v14 = vld [vmem:[%s566_s20 + $0x190] sm:$0xff] }
  0x25   : > { %409 = vst.msk [vmem:[%s585_s25 + $0xe0] sm:$0xff] %vm380_vm0, %v344_v37  ;;  %410 = vst.msk [vmem:[%s585_s25 + $0xe8] sm:$0xff] %vm380_vm0, %v345_v38  ;;  %v347_v46 = vadd.f32 %v571_v1, %v276_v39  ;;  %v280_v47 = vmul.f32 %v561_v0, %v209_v33  ;;  %v281_v48 = vmul.f32 %v561_v0, %v210_v34  ;;  %v225_v19 = vld [vmem:[%s566_s20 + $0x198] sm:$0xff]  ;;  %v226_v20 = vld [vmem:[%s566_s20 + $0x1a0] sm:$0xff] }
  0x26   : > { %v282_v49 = vmul.f32 %v561_v0, %v211_v35  ;;  %411 = vst.msk [vmem:[%s585_s25 + $0xf0] sm:$0xff] %vm380_vm0, %v346_v41  ;;  %v348_v53 = vadd.f32 %v571_v1, %v277_v42  ;;  %v349_v54 = vadd.f32 %v571_v1, %v278_v43  ;;  %v350_v55 = vadd.f32 %v571_v1, %v279_v44  ;;  %v227_v21 = vld [vmem:[%s566_s20 + $0x1a8] sm:$0xff]  ;;  %v228_v26 = vld [vmem:[%s566_s20 + $0x1b0] sm:$0xff]  ;;  %v229_v31 = vld [vmem:[%s566_s20 + $0x1b8] sm:$0xff] }
  0x27   : > { %v283_v56 = vmul.f32 %v561_v0, %v212_v40  ;;  %412 = vst.msk [vmem:[%s585_s25 + $0xf8] sm:$0xff] %vm380_vm0, %v347_v46  ;;  %v351_v60 = vadd.f32 %v571_v1, %v280_v47  ;;  %v352_v61 = vadd.f32 %v571_v1, %v281_v48  ;;  %v284_v63 = vmul.f32 %v561_v0, %v213_v45  ;;  %v230_v36 = vld [vmem:[%s566_s20 + $0x1c0] sm:$0xff]  ;;  %v231_v37 = vld [vmem:[%s566_s20 + $0x1c8] sm:$0xff]  ;;  %v232_v38 = vld [vmem:[%s566_s20 + $0x1d0] sm:$0xff] }
  0x28   : > { %v353_v62 = vadd.f32 %v571_v1, %v282_v49  ;;  %413 = vst.msk [vmem:[%s585_s25 + $0x100] sm:$0xff] %vm380_vm0, %v348_v53  ;;  %414 = vst.msk [vmem:[%s585_s25 + $0x108] sm:$0xff] %vm380_vm0, %v349_v54  ;;  %v285_v4 = vmul.f32 %v561_v0, %v214_v50  ;;  %v286_v5 = vmul.f32 %v561_v0, %v215_v51  ;;  %v233_v43 = vld [vmem:[%s566_s20 + $0x1d8] sm:$0xff]  ;;  %v234_v44 = vld [vmem:[%s566_s20 + $0x1e0] sm:$0xff] }
  0x29   : > { %415 = vst.msk [vmem:[%s585_s25 + $0x110] sm:$0xff] %vm380_vm0, %v350_v55  ;;  %v354_v3 = vadd.f32 %v571_v1, %v283_v56  ;;  %v287_v6 = vmul.f32 %v561_v0, %v216_v52  ;;  %416 = vst.msk [vmem:[%s585_s25 + $0x118] sm:$0xff] %vm380_vm0, %v351_v60  ;;  %v355_v8 = vadd.f32 %v571_v1, %v284_v63  ;;  %v235_v45 = vld [vmem:[%s566_s20 + $0x1e8] sm:$0xff]  ;;  %v236_v50 = vld [vmem:[%s566_s20 + $0x1f0] sm:$0xff] }
  0x2a   : > { %417 = vst.msk [vmem:[%s585_s25 + $0x120] sm:$0xff] %vm380_vm0, %v352_v61  ;;  %418 = vst.msk [vmem:[%s585_s25 + $0x128] sm:$0xff] %vm380_vm0, %v353_v62  ;;  %v288_v9 = vmul.f32 %v561_v0, %v217_v57  ;;  %v289_v10 = vmul.f32 %v561_v0, %v218_v58  ;;  %v290_v11 = vmul.f32 %v561_v0, %v219_v59  ;;  %v237_v55 = vld [vmem:[%s566_s20 + $0x1f8] sm:$0xff] }
  0x2b   : > { %419 = vst.msk [vmem:[%s585_s25 + $0x130] sm:$0xff] %vm380_vm0, %v354_v3  ;;  %v356_v15 = vadd.f32 %v571_v1, %v285_v4  ;;  %v357_v16 = vadd.f32 %v571_v1, %v286_v5  ;;  %v358_v17 = vadd.f32 %v571_v1, %v287_v6  ;;  %v291_v18 = vmul.f32 %v561_v0, %v220_v2 }
  0x2c   : > { %420 = vst.msk [vmem:[%s585_s25 + $0x138] sm:$0xff] %vm380_vm0, %v355_v8  ;;  %v359_v22 = vadd.f32 %v571_v1, %v288_v9  ;;  %v360_v23 = vadd.f32 %v571_v1, %v289_v10  ;;  %v361_v24 = vadd.f32 %v571_v1, %v290_v11  ;;  %v292_v25 = vmul.f32 %v561_v0, %v221_v7 }
  0x2d   : > { %421 = vst.msk [vmem:[%s585_s25 + $0x140] sm:$0xff] %vm380_vm0, %v356_v15  ;;  %422 = vst.msk [vmem:[%s585_s25 + $0x148] sm:$0xff] %vm380_vm0, %v357_v16  ;;  %v362_v27 = vadd.f32 %v571_v1, %v291_v18  ;;  %v293_v28 = vmul.f32 %v561_v0, %v222_v12  ;;  %v294_v29 = vmul.f32 %v561_v0, %v223_v13 }
  0x2e   : > { %423 = vst.msk [vmem:[%s585_s25 + $0x150] sm:$0xff] %vm380_vm0, %v358_v17  ;;  %v295_v30 = vmul.f32 %v561_v0, %v224_v14  ;;  %424 = vst.msk [vmem:[%s585_s25 + $0x158] sm:$0xff] %vm380_vm0, %v359_v22  ;;  %v363_v32 = vadd.f32 %v571_v1, %v292_v25  ;;  %v296_v33 = vmul.f32 %v561_v0, %v225_v19 }
  0x2f   : > { %425 = vst.msk [vmem:[%s585_s25 + $0x160] sm:$0xff] %vm380_vm0, %v360_v23  ;;  %426 = vst.msk [vmem:[%s585_s25 + $0x168] sm:$0xff] %vm380_vm0, %v361_v24  ;;  %v297_v34 = vmul.f32 %v561_v0, %v226_v20  ;;  %v298_v35 = vmul.f32 %v561_v0, %v227_v21  ;;  %v364_v39 = vadd.f32 %v571_v1, %v293_v28 }
  0x30   : > { %427 = vst.msk [vmem:[%s585_s25 + $0x170] sm:$0xff] %vm380_vm0, %v362_v27  ;;  %v365_v40 = vadd.f32 %v571_v1, %v294_v29  ;;  %v366_v41 = vadd.f32 %v571_v1, %v295_v30  ;;  %v299_v42 = vmul.f32 %v561_v0, %v228_v26  ;;  %428 = vst.msk [vmem:[%s585_s25 + $0x178] sm:$0xff] %vm380_vm0, %v363_v32 }
  0x31   : > { %v367_v46 = vadd.f32 %v571_v1, %v296_v33  ;;  %v368_v47 = vadd.f32 %v571_v1, %v297_v34  ;;  %v369_v48 = vadd.f32 %v571_v1, %v298_v35  ;;  %v300_v49 = vmul.f32 %v561_v0, %v229_v31  ;;  %429 = vst.msk [vmem:[%s585_s25 + $0x180] sm:$0xff] %vm380_vm0, %v364_v39 }
  0x32   : > { %430 = vst.msk [vmem:[%s585_s25 + $0x188] sm:$0xff] %vm380_vm0, %v365_v40  ;;  %431 = vst.msk [vmem:[%s585_s25 + $0x190] sm:$0xff] %vm380_vm0, %v366_v41  ;;  %v370_v51 = vadd.f32 %v571_v1, %v299_v42  ;;  %v301_v52 = vmul.f32 %v561_v0, %v230_v36  ;;  %v302_v53 = vmul.f32 %v561_v0, %v231_v37 }
  0x33   : > { %v303_v54 = vmul.f32 %v561_v0, %v232_v38  ;;  %432 = vst.msk [vmem:[%s585_s25 + $0x198] sm:$0xff] %vm380_vm0, %v367_v46  ;;  %433 = vst.msk [vmem:[%s585_s25 + $0x1a0] sm:$0xff] %vm380_vm0, %v368_v47  ;;  %v371_v56 = vadd.f32 %v571_v1, %v300_v49  ;;  %v304_v57 = vmul.f32 %v561_v0, %v233_v43 }
  0x34   : > { %434 = vst.msk [vmem:[%s585_s25 + $0x1a8] sm:$0xff] %vm380_vm0, %v369_v48  ;;  %v305_v58 = vmul.f32 %v561_v0, %v234_v44  ;;  %v306_v59 = vmul.f32 %v561_v0, %v235_v45  ;;  %435 = vst.msk [vmem:[%s585_s25 + $0x1b0] sm:$0xff] %vm380_vm0, %v370_v51  ;;  %v372_v60 = vadd.f32 %v571_v1, %v301_v52 }
  0x35   : > { %v373_v61 = vadd.f32 %v571_v1, %v302_v53  ;;  %v374_v62 = vadd.f32 %v571_v1, %v303_v54  ;;  %v307_v63 = vmul.f32 %v561_v0, %v236_v50  ;;  %436 = vst.msk [vmem:[%s585_s25 + $0x1b8] sm:$0xff] %vm380_vm0, %v371_v56  ;;  %v375_v2 = vadd.f32 %v571_v1, %v304_v57 }
  0x36   : > { %v376_v3 = vadd.f32 %v571_v1, %v305_v58  ;;  %v377_v4 = vadd.f32 %v571_v1, %v306_v59  ;;  %v308_v5 = vmul.f32 %v561_v0, %v237_v55  ;;  %437 = vst.msk [vmem:[%s585_s25 + $0x1c0] sm:$0xff] %vm380_vm0, %v372_v60 }
  0x37   : > { %438 = vst.msk [vmem:[%s585_s25 + $0x1c8] sm:$0xff] %vm380_vm0, %v373_v61  ;;  %439 = vst.msk [vmem:[%s585_s25 + $0x1d0] sm:$0xff] %vm380_vm0, %v374_v62  ;;  %v378_v6 = vadd.f32 %v571_v1, %v307_v63 }
  0x38   : > { %440 = vst.msk [vmem:[%s585_s25 + $0x1d8] sm:$0xff] %vm380_vm0, %v375_v2  ;;  %441 = vst.msk [vmem:[%s585_s25 + $0x1e0] sm:$0xff] %vm380_vm0, %v376_v3  ;;  %v379_v7 = vadd.f32 %v571_v1, %v308_v5 }
  0x39   : > { %442 = vst.msk [vmem:[%s585_s25 + $0x1e8] sm:$0xff] %vm380_vm0, %v377_v4  ;;  %443 = vst.msk [vmem:[%s585_s25 + $0x1f0] sm:$0xff] %vm380_vm0, %v378_v6 }
  0x3a   : > { %444 = vst.msk [vmem:[%s585_s25 + $0x1f8] sm:$0xff] %vm380_vm0, %v379_v7 }
  0x3b PF: > { %s13_s12 = sadd.s32 1, %s528_s12  }
  0x3c   : > { %p10_p4 = scmp.ge.s32.totalorder %s13_s12, 6  }
  0x3e   :  { %12 = sbr.rel (!%p10_p4) target bundleno = 1 (0x1), region = 62 }

</bundles_post_ra>
